<compile_context>
chip_gen: v5e
topology: v5e:2x2
jax: 0.10.0
libtpu: 0.0.40
codegen_flags: <defaults>
</compile_context>

<pallas_src>
import math

import jax
import jax.numpy as jnp
from jax.experimental import pallas as pl
from jax.experimental.pallas import tpu as pltpu

TARGET_BLOCK_BYTES = 8 * 1024 * 1024      # ~8 MiB per block (in + out double-buffered)
VMEM_LIMIT_BYTES = 48 * 1024 * 1024       # safe on v5e/v6e (128 MiB) and v7x (64 MiB)
_COL_CANDIDATES = (2048, 1024, 512, 256, 128)


def _spish_kernel(w_ref, x_ref, o_ref):
    """w_ref: SMEM (2,) f32; x_ref/o_ref: VMEM (tile_r, cols) in native dtype."""
    x = x_ref[...].astype(jnp.float32)    # upcast in-register only
    alpha = w_ref[0]
    beta = w_ref[1]

    # Only the x <= 0 branch of the output uses z, so compute it on all of x
    # and select at the end (saves the explicit pos/neg split + final add).
    z = alpha * x
    # tanh(softplus(z)) via the Mish identity, stable in t = e^{-|z|} (alpha is
    # learnable so z can be large positive or negative):
    #   z <= 0:  (t^2 + 2t) / (t^2 + 2t + 2)        with t = e^z
    #   z >  0:  (2t + 1)   / (2t^2 + 2t + 1)       with t = e^-z
    t = jnp.exp(-jnp.abs(z))              # single EUP transcendental
    t2 = t * t
    zpos = z > 0.0
    num = jnp.where(zpos, 2.0 * t + 1.0, t2 + 2.0 * t)
    den = num + 2.0 * jnp.where(zpos, t2, 1.0)

    # Approx reciprocal (EUP slot) + 1 Newton step: den in [1,5] -> ~f32 accuracy.
    r = pl.reciprocal(den, approx=True)
    r = r * (2.0 - den * r)
    tanh_sp = num * r

    y = jnp.where(x > 0.0, x, x * tanh_sp * beta)
    o_ref[...] = y.astype(o_ref.dtype)


def spish_pallas(x, weight):
    """SPish forward. x: any-shaped array (NCHW expected), weight: (2,) array."""
    orig_shape = x.shape
    n = x.size
    itemsize = jnp.dtype(x.dtype).itemsize
    pack = max(8, 32 // max(itemsize, 1))   # sublane packing: 8 f32 / 16 bf16 / 32 int8
    flat = x.reshape(-1)

    # Pick a lane-dense column width that divides n so no padded copy is needed;
    # fall back to padding to a 128-multiple only when unavoidable.
    cols = None
    for c in _COL_CANDIDATES:
        if n % c == 0:
            cols = c
            break
    if cols is None:
        cols = 128
        pad = (-n) % cols
        flat = jnp.pad(flat, (0, pad))
    else:
        pad = 0

    rows = (n + pad) // cols
    x2d = flat.reshape(rows, cols)          # free reshape of contiguous buffer

    # Row tile from the byte budget, rounded to the dtype's sublane pack.
    budget_rows = max(pack, (TARGET_BLOCK_BYTES // (cols * itemsize)) // pack * pack)
    if rows <= pack:
        tile_r = rows                       # block == full array dim (allowed)
    else:
        tile_r = min(budget_rows, (rows // pack) * pack)
        if tile_r >= rows and rows >= 2 * pack:
            # Whole tensor fits in one block: split into 2 programs so the
            # "parallel" grid axis can use both TensorCores on v7x.
            half = -(-rows // 2)
            tile_r = -(-half // pack) * pack
    grid = (pl.cdiv(rows, tile_r),)         # partial last block handled by Pallas

    w = jnp.asarray(weight, jnp.float32).reshape(2)

    out2d = pl.pallas_call(
        _spish_kernel,
        out_shape=jax.ShapeDtypeStruct((rows, cols), x.dtype),  # native dtype I/O
        grid=grid,
        in_specs=[
            pl.BlockSpec(memory_space=pltpu.MemorySpace.SMEM),   # weight (2,), grid-invariant
            pl.BlockSpec((tile_r, cols), lambda i: (i, 0)),      # x tile
        ],
        out_specs=pl.BlockSpec((tile_r, cols), lambda i: (i, 0)),
        compiler_params=pltpu.CompilerParams(
            dimension_semantics=("parallel",),       # shards grid across TCs on v7x
            vmem_limit_bytes=VMEM_LIMIT_BYTES,
        ),
    )(w, x2d)

    out = out2d.reshape(-1)
    if pad:
        out = out[:n]
    return out.reshape(orig_shape)


def spish_ref(x, weight):
    """Pure-JAX reference of the same semantics."""
    xf = x.astype(jnp.float32)
    w = jnp.asarray(weight, jnp.float32)
    pos = jnp.maximum(xf, 0.0)
    neg = jnp.minimum(xf, 0.0)
    z = w[0] * neg
    sp = jnp.maximum(z, 0.0) + jnp.log1p(jnp.exp(-jnp.abs(z)))
    pished_neg = neg * jnp.tanh(sp) * w[1]
    return (pished_neg + pos).astype(x.dtype)


if __name__ == "__main__":
    key = jax.random.PRNGKey(0)
    weight = jnp.array([0.1, 1.0], dtype=jnp.float32)  # Parameter([0.1, 1])

    # f32 NCHW input (matches the module's elementwise forward).
    x = jax.random.normal(key, (2, 4, 16, 16), dtype=jnp.float32)
    y = jax.block_until_ready(spish_pallas(x, weight))
    y_ref = spish_ref(x, weight)
    assert y.shape == x.shape and y.dtype == x.dtype
    assert jnp.allclose(y, y_ref, atol=1e-5, rtol=1e-5), "f32 mismatch vs reference"

    # bf16 path: HBM traffic stays bf16, compute in f32 registers.
    xb = jax.random.normal(jax.random.PRNGKey(1), (4, 8, 32, 32), dtype=jnp.bfloat16)
    yb = jax.block_until_ready(spish_pallas(xb, weight))
    yb_ref = spish_ref(xb, weight)
    assert yb.shape == xb.shape and yb.dtype == xb.dtype
    assert jnp.allclose(
        yb.astype(jnp.float32), yb_ref.astype(jnp.float32), atol=2e-2, rtol=2e-2
    ), "bf16 mismatch vs reference"

    # Awkward size: exercises the padded 128-col fallback and the multi-block
    # (masked partial last block) path.
    xo = jax.random.normal(jax.random.PRNGKey(2), (3, 5, 17, 11), dtype=jnp.float32)
    yo = jax.block_until_ready(spish_pallas(xo, weight))
    yo_ref = spish_ref(xo, weight)
    assert yo.shape == xo.shape and yo.dtype == xo.dtype
    assert jnp.allclose(yo, yo_ref, atol=1e-5, rtol=1e-5), "padded-path mismatch"

    print("KERNEL_OK")
</pallas_src>

<mosaic_0001>
module attributes {stable_mosaic.version = 11 : i64} {
  func.func @_spish_kernel(%arg0: i32, %arg1: memref<2xf32, #tpu.memory_space<smem>>, %arg2: memref<1x2048xf32, #tpu.memory_space<vmem>>, %arg3: memref<1x2048xf32, #tpu.memory_space<vmem>>) attributes {dimension_semantics = [#tpu.dimension_semantics<parallel>], iteration_bounds = array<i64: 1>, scalar_prefetch = 0 : i64, scratch_operands = 0 : i64, tpu.core_type = #tpu.core_type<tc>, window_params = [{transform_indices = @transform_0, window_bounds = array<i64: 2>}, {transform_indices = @transform_1, window_bounds = array<i64: 1, 2048>}, {transform_indices = @transform_2, window_bounds = array<i64: 1, 2048>}]} {
    %c0 = arith.constant 0 : index
    %c0_0 = arith.constant 0 : index
    %0 = vector.load %arg2[%c0, %c0_0] : memref<1x2048xf32, #tpu.memory_space<vmem>>, vector<1x2048xf32>
    %c0_1 = arith.constant 0 : index
    %1 = memref.load %arg1[%c0_1] : memref<2xf32, #tpu.memory_space<smem>>
    %c1 = arith.constant 1 : index
    %2 = memref.load %arg1[%c1] : memref<2xf32, #tpu.memory_space<smem>>
    %3 = vector.broadcast %1 : f32 to vector<1x2048xf32>
    %4 = arith.mulf %3, %0 : vector<1x2048xf32>
    %5 = math.absf %4 : vector<1x2048xf32>
    %cst = arith.constant 0.000000e+00 : f32
    %6 = vector.broadcast %cst : f32 to vector<1x2048xf32>
    %7 = arith.subf %6, %5 : vector<1x2048xf32>
    %8 = math.exp %7 : vector<1x2048xf32>
    %9 = arith.mulf %8, %8 : vector<1x2048xf32>
    %cst_2 = arith.constant 0.000000e+00 : f32
    %10 = vector.broadcast %cst_2 : f32 to vector<1x2048xf32>
    %11 = arith.cmpf ogt, %4, %10 : vector<1x2048xf32>
    %cst_3 = arith.constant 2.000000e+00 : f32
    %12 = vector.broadcast %cst_3 : f32 to vector<1x2048xf32>
    %13 = arith.mulf %12, %8 : vector<1x2048xf32>
    %cst_4 = arith.constant 1.000000e+00 : f32
    %14 = vector.broadcast %cst_4 : f32 to vector<1x2048xf32>
    %15 = arith.addf %13, %14 : vector<1x2048xf32>
    %cst_5 = arith.constant 2.000000e+00 : f32
    %16 = vector.broadcast %cst_5 : f32 to vector<1x2048xf32>
    %17 = arith.mulf %16, %8 : vector<1x2048xf32>
    %18 = arith.addf %9, %17 : vector<1x2048xf32>
    %19 = arith.select %11, %15, %18 : vector<1x2048xi1>, vector<1x2048xf32>
    %cst_6 = arith.constant 1.000000e+00 : f32
    %20 = vector.broadcast %cst_6 : f32 to vector<1x2048xf32>
    %21 = arith.select %11, %9, %20 : vector<1x2048xi1>, vector<1x2048xf32>
    %cst_7 = arith.constant 2.000000e+00 : f32
    %22 = vector.broadcast %cst_7 : f32 to vector<1x2048xf32>
    %23 = arith.mulf %22, %21 : vector<1x2048xf32>
    %24 = arith.addf %19, %23 : vector<1x2048xf32>
    %25 = tpu.reciprocal %24 {approx = true} : vector<1x2048xf32> -> vector<1x2048xf32>
    %26 = arith.mulf %24, %25 : vector<1x2048xf32>
    %cst_8 = arith.constant 2.000000e+00 : f32
    %27 = vector.broadcast %cst_8 : f32 to vector<1x2048xf32>
    %28 = arith.subf %27, %26 : vector<1x2048xf32>
    %29 = arith.mulf %25, %28 : vector<1x2048xf32>
    %30 = arith.mulf %19, %29 : vector<1x2048xf32>
    %cst_9 = arith.constant 0.000000e+00 : f32
    %31 = vector.broadcast %cst_9 : f32 to vector<1x2048xf32>
    %32 = arith.cmpf ogt, %0, %31 : vector<1x2048xf32>
    %33 = arith.mulf %0, %30 : vector<1x2048xf32>
    %34 = vector.broadcast %2 : f32 to vector<1x2048xf32>
    %35 = arith.mulf %33, %34 : vector<1x2048xf32>
    %36 = arith.select %32, %0, %35 : vector<1x2048xi1>, vector<1x2048xf32>
    %c0_10 = arith.constant 0 : index
    %c0_11 = arith.constant 0 : index
    %37 = vector.load %arg3[%c0_10, %c0_11] : memref<1x2048xf32, #tpu.memory_space<vmem>>, vector<1x2048xf32>
    tpu.vector_store %arg3[%c0_10, %c0_11], %36 {strides = array<i32>} : memref<1x2048xf32, #tpu.memory_space<vmem>>, vector<1x2048xf32>,
    return
  }
  func.func @transform_0(%arg0: i32) -> i32 {
    %c0_i32 = arith.constant 0 : i32
    %c0_i32_0 = arith.constant 0 : i32
    return %c0_i32 : i32
  }
  func.func @transform_1(%arg0: i32) -> (i32, i32) {
    %c0_i32 = arith.constant 0 : i32
    %c0_i32_0 = arith.constant 0 : i32
    return %arg0, %c0_i32 : i32, i32
  }
  func.func @transform_2(%arg0: i32) -> (i32, i32) {
    %c0_i32 = arith.constant 0 : i32
    %c0_i32_0 = arith.constant 0 : i32
    return %arg0, %c0_i32 : i32, i32
  }
}

</mosaic_0001>

<bundles_post_ra>
// kernel: tpu_custom_call.1
= control target key start
LH: loop header
LB: loop body
LE: loop exit
PB: predicated region body
PF: predicated region fallthrough
CT: control target
= control target key end

     0   :  { %7 = vsyncpa [#allocation5], 0  ;;  %s216_s0 = inlined_call_operand.hbm [shape: f32[2], index: 0, kind: input, shape index: {}]   ;;  %s217_s1 = inlined_call_operand.hbm [shape: f32[1,2048], index: 1, kind: input, shape index: {}]   ;;  %s218_s2 = inlined_call_operand.hbm [shape: f32[1,2048], index: 2, kind: output, shape index: {}]  }
   0x1   :  { %8 = vsyncpa [#allocation3], 0 }
   0x2   :  { %9 = vsyncpa [#allocation4], 0  ;;  %s15_s11 = sshll.u32 %s216_s0, 4  ;;  %s24_s14 = sshll.u32 %s217_s1, 4  ;;  %s16_s11 = int_to_ptr.hbm [resolvable:$true] %s15_s11  ;;  %s25_s14 = int_to_ptr.hbm [resolvable:$true] %s24_s14 }
   0x3   :  { %s189_s15 = smov [#allocation2]   ;;  %s190_s16 = smov [#allocation6]  }
   0x4   :  { %18 = dma.hbm_to_smem %s16_s11, 16, %s189_s15, [#allocation5]  }
   0x5   :  { %s26_s17 = sshll.u32 %s190_s16, 4  ;;  %s27_s17 = int_to_ptr.vmem [resolvable:$true] %s26_s17 }
   0x6   :  { %29 = dma.hbm_to_vmem [thread:$0]  %s25_s14, 256, %s27_s17, [#allocation3]  }
   0x7   :  { %183 = dma.done.wait [#allocation5], 16  }
   0x8   :  { %184 = vsyncadd [#allocation5], 4294967280 }
   0x9   :  { %185 = dma.done.wait [#allocation3], 256  }
   0xa   :  { %186 = vsyncadd [#allocation3], 4294967040 }
   0xb   :  { %38 = sfence }
   0xc   :  { %s41_s18 = sld [smem:[#allocation2]]  ;;  %v39_v0 = vld [vmem:[#allocation6] sm:$0xff]  ;;  %v40_v1 = vld [vmem:[#allocation6 + $0x8] sm:$0xff]  ;;  %s191_s1 = smov [#allocation7]  }
   0xd   :  { %s111_s0 = sld [smem:[#allocation2 + $0x1]]  ;;  %vm82_vm2 = vcmp.gt.f32.partialorder %v39_v0, 0.0  ;;  %s98_s19 = sshll.u32 %s191_s1, 4  ;;  %vm83_vm3 = vcmp.gt.f32.partialorder %v40_v1, 0.0  ;;  %s99_s19 = int_to_ptr.vmem [resolvable:$true] %s98_s19 }
   0xe   :  { %s100_s22 = sshll.u32 %s218_s2, 4  ;;  %s101_s22 = int_to_ptr.hbm [resolvable:$true] %s100_s22 }
  0x12   :  { %v43_v2 = vstv %s41_s18 }
  0x13   :  { %v44_v3 = vmul.f32 %v43_v2, %v39_v0  ;;  %v45_v4 = vmul.f32 %v43_v2, %v40_v1  ;;  %v86_v38 = vstv %s111_s0 }
  0x15   :  { %v46_v5 = vand.u32 2147483647, %v44_v3  ;;  %v47_v6 = vand.u32 2147483647, %v45_v4  ;;  %vm56_vm0 = vcmp.gt.f32.partialorder %v44_v3, 0.0  ;;  %vm57_vm1 = vcmp.gt.f32.partialorder %v45_v4, 0.0 }
  0x17   :  { %v48_v7 = vsub.f32 0.0, %v46_v5  ;;  %v49_v8 = vsub.f32 0.0, %v47_v6 }
  0x19   :  { %v50_v9 = vmul.f32 1.442695, %v48_v7  ;;  %v52_v10 = vmul.f32 1.442695, %v49_v8 }
  0x1b   :  { %115 = vpow2.f32 %v50_v9 }
  0x1c   :  { %117 = vpow2.f32 %v52_v10 }
  0x21   :  { %v116_v11 = vpop.eup %115 }
  0x22   :  { %v118_v12 = vpop.eup %117  ;;  %v54_v13 = vmul.f32 %v116_v11, %v116_v11  ;;  %v58_v14 = vmul.f32 2.0, %v116_v11 }
  0x23   :  { %v55_v15 = vmul.f32 %v118_v12, %v118_v12  ;;  %v59_v16 = vmul.f32 2.0, %v118_v12 }
  0x24   :  { %v60_v17 = vadd.f32 1.0, %v58_v14  ;;  %v62_v18 = vadd.f32 %v58_v14, %v54_v13  ;;  %v66_v19 = vsel %vm56_vm0, %v54_v13, 1.0 }
  0x25   :  { %v68_v20 = vmul.f32 2.0, %v66_v19  ;;  %v61_v21 = vadd.f32 1.0, %v59_v16  ;;  %v63_v22 = vadd.f32 %v59_v16, %v55_v15  ;;  %v67_v23 = vsel %vm57_vm1, %v55_v15, 1.0 }
  0x26   :  { %v64_v24 = vsel %vm56_vm0, %v60_v17, %v62_v18  ;;  %v69_v25 = vmul.f32 2.0, %v67_v23 }
  0x27   :  { %v70_v26 = vadd.f32 %v68_v20, %v64_v24  ;;  %v65_v27 = vsel %vm57_vm1, %v61_v21, %v63_v22 }
  0x28   :  { %v71_v28 = vadd.f32 %v69_v25, %v65_v27 }
  0x29   :  { %119 = vrcp.f32 %v70_v26 }
  0x2a   :  { %121 = vrcp.f32 %v71_v28 }
  0x2f   :  { %v120_v29 = vpop.eup %119 }
  0x30   :  { %v122_v30 = vpop.eup %121  ;;  %v74_v31 = vmul.f32 %v120_v29, %v70_v26 }
  0x31   :  { %v75_v32 = vmul.f32 %v122_v30, %v71_v28 }
  0x32   :  { %v76_v33 = vsub.f32 2.0, %v74_v31 }
  0x33   :  { %v77_v34 = vsub.f32 2.0, %v75_v32 }
  0x34   :  { %v78_v35 = vmul.f32 %v120_v29, %v76_v33 }
  0x35   :  { %v79_v36 = vmul.f32 %v122_v30, %v77_v34 }
  0x36   :  { %v80_v37 = vmul.f32 %v78_v35, %v64_v24 }
  0x37   :  { %v81_v39 = vmul.f32 %v79_v36, %v65_v27 }
  0x38   :  { %v84_v40 = vmul.f32 %v80_v37, %v39_v0 }
  0x39   :  { %v85_v41 = vmul.f32 %v81_v39, %v40_v1 }
  0x3a   :  { %v87_v42 = vmul.f32 %v86_v38, %v84_v40 }
  0x3b   :  { %v88_v43 = vmul.f32 %v86_v38, %v85_v41 }
  0x3c   :  { %v89_v44 = vsel %vm82_vm2, %v39_v0, %v87_v42 }
  0x3d   :  { %91 = vst [vmem:[#allocation7] sm:$0xff] %v89_v44  ;;  %v90_v45 = vsel %vm83_vm3, %v40_v1, %v88_v43 }
  0x3e   :  { %92 = vst [vmem:[#allocation7 + $0x8] sm:$0xff] %v90_v45 }
  0x3f   :  { %103 = dma.vmem_to_hbm [thread:$0]  %s99_s19, 256, %s101_s22, [#allocation4]  }
  0x40   :  { %187 = dma.done.wait [#allocation4], 256  }
  0x41   :  { %188 = vsyncadd [#allocation4], 4294967040 }
  0x42   :  { %108 = vsyncpa [#allocation3], 1 }
  0x43   :  { %109 = vsyncpa [#allocation4], 1 }
  0x44   :  { %110 = vsyncpa [#allocation5], 1 }

</bundles_post_ra>
